<compile_context>
chip_gen: v6e
topology: v6e:2x2x1
jax: 0.10.0
libtpu: 0.0.40
codegen_flags: <defaults>
</compile_context>

<pallas_src>
import math
from itertools import product

import jax
import jax.numpy as jnp
from jax import lax
from jax.experimental import pallas as pl
from jax.experimental.pallas import tpu as pltpu

EPS = 1e-5                       # nn.BatchNorm2d default eps
_INV_SQRT2 = 1.0 / math.sqrt(2.0)


def _stats_kernel(p_ref, w_ref, sum_ref, ssq_ref):
    """Pass 1: conv tile (4*Cout, tm) on the MXU, accumulate per-row sum / sumsq."""
    @pl.when(pl.program_id(1) == 0)          # start of this group's tile sweep
    def _():
        sum_ref[...] = jnp.zeros_like(sum_ref)
        ssq_ref[...] = jnp.zeros_like(ssq_ref)

    conv = jnp.dot(w_ref[...], p_ref[...], preferred_element_type=jnp.float32)
    sum_ref[...] += jnp.sum(conv, axis=1, keepdims=True)
    ssq_ref[...] += jnp.sum(conv * conv, axis=1, keepdims=True)


def _apply_kernel(p_ref, w_ref, scale_ref, shift_ref, o_ref):
    """Pass 2: recompute conv tile, fused BN scale/shift + exact GELU, lane-dense store."""
    conv = jnp.dot(w_ref[...], p_ref[...], preferred_element_type=jnp.float32)
    y = conv * scale_ref[...] + shift_ref[...]     # (4*Cout, 1) broadcast along lanes
    o_ref[...] = 0.5 * y * (1.0 + lax.erf(y * _INV_SQRT2))


def vqvae_dec_block(x_nchw, weight, bias, gamma, beta, *, tm=2048):
    """x_nchw: (N, Cin, H, W) f32; weight: (Cout, Cin, 3, 3); bias/gamma/beta: (Cout,).

    Returns (N, Cout, 2H, 2W), matching the PyTorch module in train mode.
    """
    del bias  # conv bias only shifts the per-channel mean, which train-mode BN removes.

    N, Cin, H, W = x_nchw.shape
    Cout = weight.shape[0]
    x = x_nchw.astype(jnp.float32)
    w = weight.astype(jnp.float32)

    # ---- Fold (nearest x2 upsample -> 3x3 conv, zero pad 1) into 4 parity classes.
    # Output pixel (2i+py, 2j+px) = sum_{kh,kw} W[:,:,kh,kw] * Xp[:, i+dr, j+dc]
    # with dr = (py+kh+1)//2, dc = (px+kw+1)//2, Xp = X zero-padded by 1.
    K = 9 * Cin
    R = 4 * Cout
    w_all = jnp.zeros((R, K), jnp.float32)          # row = (2*py+px)*Cout + o
    for py, px in product(range(2), range(2)):
        par = 2 * py + px
        for kh in range(3):
            for kw in range(3):
                dr = (py + kh + 1) // 2
                dc = (px + kw + 1) // 2
                t = 3 * dr + dc                      # K index = c*9 + t
                w_all = w_all.at[par * Cout:(par + 1) * Cout, t::9].add(w[:, :, kh, kw])

    # ---- Compact im2col at ORIGINAL resolution, built directly in (Cin, 9, N, H, W)
    # order so the final reshape to (K, M) is contiguous: P[c*9 + t, n*H*W + i*W + j].
    xt = jnp.pad(x.transpose(1, 0, 2, 3), ((0, 0), (0, 0), (1, 1), (1, 1)))  # (Cin,N,H+2,W+2)
    taps = jnp.stack([xt[:, :, dr:dr + H, dc:dc + W]
                      for dr in range(3) for dc in range(3)], axis=1)        # (Cin,9,N,H,W)
    M = N * H * W
    patches = taps.reshape(K, M)

    # ---- Tiling.  Zero-padded columns contribute exactly 0 to both statistics (there is
    # no bias term), so the global stats stay correct; padded outputs are sliced off.
    tm = max(128, min(int(tm), 8192))
    tm = (tm // 128) * 128
    tm = min(tm, max(128, ((M + 127) // 128) * 128))   # don't over-pad tiny problems
    num_tiles = (M + tm - 1) // tm
    G = 2 if num_tiles >= 2 else 1                     # stat groups (megacore split on v7x)
    tpg = (num_tiles + G - 1) // G                     # tiles per group
    m_pad = G * tpg * tm
    if m_pad != M:
        patches = jnp.pad(patches, ((0, 0), (0, m_pad - M)))

    # ---- Pass 1: per-group conv statistics (resident accumulator blocks per group).
    p_spec1 = pl.BlockSpec((K, tm), lambda g, t: (0, g * tpg + t))
    w_spec1 = pl.BlockSpec((R, K), lambda g, t: (0, 0))
    stat_spec = pl.BlockSpec((R, 1), lambda g, t: (g, 0))
    row_sum_p, row_ssq_p = pl.pallas_call(
        _stats_kernel,
        out_shape=(jax.ShapeDtypeStruct((G * R, 1), jnp.float32),
                   jax.ShapeDtypeStruct((G * R, 1), jnp.float32)),
        grid=(G, tpg),
        in_specs=[p_spec1, w_spec1],
        out_specs=(stat_spec, stat_spec),
        compiler_params=pltpu.CompilerParams(
            dimension_semantics=("parallel", "arbitrary")),
    )(patches, w_all)

    # ---- Fold BN (train-mode, biased variance) + affine into one scale/shift per row.
    count = jnp.float32(N * (2 * H) * (2 * W))          # = 4 * M real output pixels
    ch_sum = row_sum_p.reshape(G, 4, Cout).sum(axis=(0, 1))
    ch_ssq = row_ssq_p.reshape(G, 4, Cout).sum(axis=(0, 1))
    mean = ch_sum / count
    var = ch_ssq / count - mean * mean
    scale = gamma.astype(jnp.float32) * lax.rsqrt(var + EPS)
    shift = beta.astype(jnp.float32) - mean * scale
    scale_rows = jnp.tile(scale, 4).reshape(R, 1)
    shift_rows = jnp.tile(shift, 4).reshape(R, 1)

    # ---- Pass 2: recompute conv, normalize + GELU, lane-dense stores; fully parallel grid.
    total_tiles = G * tpg
    p_spec2 = pl.BlockSpec((K, tm), lambda i: (0, i))
    w_spec2 = pl.BlockSpec((R, K), lambda i: (0, 0))
    col_spec = pl.BlockSpec((R, 1), lambda i: (0, 0))
    out_slab = pl.pallas_call(
        _apply_kernel,
        out_shape=jax.ShapeDtypeStruct((R, m_pad), jnp.float32),
        grid=(total_tiles,),
        in_specs=[p_spec2, w_spec2, col_spec, col_spec],
        out_specs=pl.BlockSpec((R, tm), lambda i: (0, i)),
        compiler_params=pltpu.CompilerParams(dimension_semantics=("parallel",)),
    )(patches, w_all, scale_rows, shift_rows)

    # ---- (py, px, o, n, i, j) -> NCHW pixel-shuffle back to (N, Cout, 2H, 2W).
    out = out_slab[:, :M].reshape(2, 2, Cout, N, H, W)
    out = out.transpose(3, 2, 4, 0, 5, 1).reshape(N, Cout, 2 * H, 2 * W)
    return out


def _reference(x, weight, bias, gamma, beta):
    """Plain-JAX reference of the PyTorch forward (for a correctness check)."""
    up = jnp.repeat(jnp.repeat(x, 2, axis=2), 2, axis=3)
    conv = lax.conv_general_dilated(
        up, weight, window_strides=(1, 1), padding=((1, 1), (1, 1)),
        dimension_numbers=("NCHW", "OIHW", "NCHW"),
    ) + bias[None, :, None, None]
    mean = conv.mean(axis=(0, 2, 3), keepdims=True)
    var = ((conv - mean) ** 2).mean(axis=(0, 2, 3), keepdims=True)
    y = (conv - mean) * lax.rsqrt(var + EPS)
    y = y * gamma[None, :, None, None] + beta[None, :, None, None]
    return 0.5 * y * (1.0 + lax.erf(y / jnp.sqrt(2.0)))


if __name__ == "__main__":
    # Small shapes consistent with the module: NCHW input, 4 -> 8 channels, 16x16 -> 32x32.
    N, Cin, H, W = 2, 4, 16, 16
    Cout = 8

    key = jax.random.PRNGKey(0)
    kx, kw_, kb, kg, kbeta = jax.random.split(key, 5)

    x = jax.random.normal(kx, (N, Cin, H, W), dtype=jnp.float32)

    # Deterministic synthetic parameters (Conv2d-style fan-in uniform; BN affine
    # perturbed away from identity so it is actually exercised).
    fan_in = Cin * 3 * 3
    bound = 1.0 / math.sqrt(fan_in)
    weight = jax.random.uniform(kw_, (Cout, Cin, 3, 3), jnp.float32, -bound, bound)
    bias = jax.random.uniform(kb, (Cout,), jnp.float32, -bound, bound)
    gamma = 1.0 + 0.1 * jax.random.normal(kg, (Cout,), dtype=jnp.float32)
    beta = 0.1 * jax.random.normal(kbeta, (Cout,), dtype=jnp.float32)

    # tm=128 -> 4 M-tiles / 2 stat groups so cross-tile accumulation, the parallel group
    # axis and pipelining are all exercised.
    out = jax.block_until_ready(vqvae_dec_block(x, weight, bias, gamma, beta, tm=128))
    ref = jax.block_until_ready(_reference(x, weight, bias, gamma, beta))

    assert out.shape == (N, Cout, 2 * H, 2 * W), out.shape
    assert bool(jnp.allclose(out, ref, atol=1e-4, rtol=1e-4)), \
        float(jnp.max(jnp.abs(out - ref)))

    print("KERNEL_OK")
</pallas_src>

<mosaic_0001>
module attributes {stable_mosaic.version = 11 : i64} {
  func.func @_stats_kernel(%arg0: i32, %arg1: i32, %arg2: memref<36x128xf32, #tpu.memory_space<vmem>>, %arg3: memref<32x36xf32, #tpu.memory_space<vmem>>, %arg4: memref<32x1xf32, #tpu.memory_space<vmem>>, %arg5: memref<32x1xf32, #tpu.memory_space<vmem>>) attributes {dimension_semantics = [#tpu.dimension_semantics<parallel>, #tpu.dimension_semantics<arbitrary>], iteration_bounds = array<i64: 2, 2>, scalar_prefetch = 0 : i64, scratch_operands = 0 : i64, tpu.core_type = #tpu.core_type<tc>, window_params = [{transform_indices = @transform_0, window_bounds = array<i64: 36, 128>}, {pipeline_mode = #tpu.pipeline_mode<synchronous>, transform_indices = @transform_1, window_bounds = array<i64: 32, 36>}, {transform_indices = @transform_2, window_bounds = array<i64: 32, 1>}, {transform_indices = @transform_3, window_bounds = array<i64: 32, 1>}]} {
    %c0_i32 = arith.constant 0 : i32
    %0 = arith.cmpi eq, %arg1, %c0_i32 : i32
    %1 = arith.extui %0 : i1 to i32
    %c0_i32_0 = arith.constant 0 : i32
    %2 = arith.cmpi ne, %1, %c0_i32_0 : i32
    scf.if %2 {
      %cst_14 = arith.constant 0.000000e+00 : f32
      %17 = vector.broadcast %cst_14 : f32 to vector<32x1xf32>
      %c0_15 = arith.constant 0 : index
      %c0_16 = arith.constant 0 : index
      %18 = vector.load %arg4[%c0_15, %c0_16] : memref<32x1xf32, #tpu.memory_space<vmem>>, vector<32x1xf32>
      tpu.vector_store %arg4[%c0_15, %c0_16], %17 {strides = array<i32>} : memref<32x1xf32, #tpu.memory_space<vmem>>, vector<32x1xf32>,
      %cst_17 = arith.constant 0.000000e+00 : f32
      %19 = vector.broadcast %cst_17 : f32 to vector<32x1xf32>
      %c0_18 = arith.constant 0 : index
      %c0_19 = arith.constant 0 : index
      %20 = vector.load %arg5[%c0_18, %c0_19] : memref<32x1xf32, #tpu.memory_space<vmem>>, vector<32x1xf32>
      tpu.vector_store %arg5[%c0_18, %c0_19], %19 {strides = array<i32>} : memref<32x1xf32, #tpu.memory_space<vmem>>, vector<32x1xf32>,
    } else {
    }
    %c0 = arith.constant 0 : index
    %c0_1 = arith.constant 0 : index
    %3 = vector.load %arg3[%c0, %c0_1] : memref<32x36xf32, #tpu.memory_space<vmem>>, vector<32x36xf32>
    %c0_2 = arith.constant 0 : index
    %c0_3 = arith.constant 0 : index
    %4 = vector.load %arg2[%c0_2, %c0_3] : memref<36x128xf32, #tpu.memory_space<vmem>>, vector<36x128xf32>
    %cst = arith.constant dense<0.000000e+00> : vector<32x128xf32>
    %5 = tpu.matmul %3, %4, %cst {dimension_numbers = #tpu.dot_dimension_numbers<[1], [0], [0], [1], [0, 0, 1, 1], [], []>} : vector<32x36xf32>, vector<36x128xf32>, vector<32x128xf32> -> vector<32x128xf32>
    %c0_4 = arith.constant 0 : index
    %c0_5 = arith.constant 0 : index
    %6 = vector.load %arg4[%c0_4, %c0_5] : memref<32x1xf32, #tpu.memory_space<vmem>>, vector<32x1xf32>
    %cst_6 = arith.constant dense<0.000000e+00> : vector<32xf32>
    %7 = vector.multi_reduction <add>, %5, %cst_6 [1] : vector<32x128xf32> to vector<32xf32>
    %8 = vector.shape_cast %7 : vector<32xf32> to vector<32x1xf32>
    %9 = arith.addf %6, %8 : vector<32x1xf32>
    %c0_7 = arith.constant 0 : index
    %c0_8 = arith.constant 0 : index
    %10 = vector.load %arg4[%c0_7, %c0_8] : memref<32x1xf32, #tpu.memory_space<vmem>>, vector<32x1xf32>
    tpu.vector_store %arg4[%c0_7, %c0_8], %9 {strides = array<i32>} : memref<32x1xf32, #tpu.memory_space<vmem>>, vector<32x1xf32>,
    %c0_9 = arith.constant 0 : index
    %c0_10 = arith.constant 0 : index
    %11 = vector.load %arg5[%c0_9, %c0_10] : memref<32x1xf32, #tpu.memory_space<vmem>>, vector<32x1xf32>
    %12 = arith.mulf %5, %5 : vector<32x128xf32>
    %cst_11 = arith.constant dense<0.000000e+00> : vector<32xf32>
    %13 = vector.multi_reduction <add>, %12, %cst_11 [1] : vector<32x128xf32> to vector<32xf32>
    %14 = vector.shape_cast %13 : vector<32xf32> to vector<32x1xf32>
    %15 = arith.addf %11, %14 : vector<32x1xf32>
    %c0_12 = arith.constant 0 : index
    %c0_13 = arith.constant 0 : index
    %16 = vector.load %arg5[%c0_12, %c0_13] : memref<32x1xf32, #tpu.memory_space<vmem>>, vector<32x1xf32>
    tpu.vector_store %arg5[%c0_12, %c0_13], %15 {strides = array<i32>} : memref<32x1xf32, #tpu.memory_space<vmem>>, vector<32x1xf32>,
    return
  }
  func.func @transform_0(%arg0: i32, %arg1: i32) -> (i32, i32) {
    %c2_i32 = arith.constant 2 : i32
    %0 = arith.muli %arg0, %c2_i32 : i32
    %1 = arith.addi %0, %arg1 : i32
    %c0_i32 = arith.constant 0 : i32
    %c0_i32_0 = arith.constant 0 : i32
    return %c0_i32, %1 : i32, i32
  }
  func.func @transform_1(%arg0: i32, %arg1: i32) -> (i32, i32) {
    %c0_i32 = arith.constant 0 : i32
    %c0_i32_0 = arith.constant 0 : i32
    %c0_i32_1 = arith.constant 0 : i32
    return %c0_i32, %c0_i32_0 : i32, i32
  }
  func.func @transform_2(%arg0: i32, %arg1: i32) -> (i32, i32) {
    %c0_i32 = arith.constant 0 : i32
    %c0_i32_0 = arith.constant 0 : i32
    return %arg0, %c0_i32 : i32, i32
  }
  func.func @transform_3(%arg0: i32, %arg1: i32) -> (i32, i32) {
    %c0_i32 = arith.constant 0 : i32
    %c0_i32_0 = arith.constant 0 : i32
    return %arg0, %c0_i32 : i32, i32
  }
}

</mosaic_0001>

<bundles_post_ra>
// kernel: tpu_custom_call.1
= control target key start
LH: loop header
LB: loop body
LE: loop exit
PB: predicated region body
PF: predicated region fallthrough
CT: control target
= control target key end

     0   :  { %s1034_s0 = inlined_call_operand.hbm [shape: f32[36,512], index: 0, kind: input, shape index: {}]   ;;  %s1035_s1 = inlined_call_operand.hbm [shape: f32[32,36], index: 1, kind: input, shape index: {}]   ;;  %s1036_s2 = inlined_call_operand.vmem [shape: f32[64,1], index: 2, kind: output, shape index: {0}]   ;;  %s1037_s3 = inlined_call_operand.vmem [shape: f32[64,1], index: 3, kind: output, shape index: {1}]  }
   0x1   :  { %1043 = sst [smem:[#allocation9_spill]] %s1035_s1 }
   0x2   :  { %9 = vsyncpa [#allocation3], 0 }
   0x3   :  { %11 = vsyncpa [#allocation3 + $0x1], 0 }
   0x4   :  { %12 = vsyncpa [#allocation5], 0  ;;  %s832_s12 = smov 0   ;;  %s834_s13 = smov 0  }
   0x5   :  { %s836_s14 = smov 0   ;;  %s838_s15 = smov 0  }
   0x6   :  { %s840_s16 = smov 0   ;;  %s842_s17 = smov 0  }
   0x7   :  { %s844_s18 = smov 0   ;;  %s846_s19 = smov 0  }
   0x8 LB: > { %1044 = sst [smem:[#allocation8_spill]] %s800_s18  ;;  %s534_s20 = sadd.s32 4294967295, %s804_s19   ;;  %s804_s19 = sphi %s846_s19, %s18_s19   ;;  %s800_s18 = sphi %s844_s18, %s1062_s18   ;;  %s796_s17 = sphi %s842_s17, %s1061_s17   ;;  %s792_s16 = sphi %s840_s16, %s1056_s16   ;;  %s788_s15 = sphi %s838_s15, %s1060_s15   ;;  %s784_s14 = sphi %s836_s14, %s1059_s14   ;;  %s780_s13 = sphi %s834_s13, %s1058_s13   ;;  %s776_s12 = sphi %s832_s12, %s1057_s12  }
   0x9   : > { %p48_p0 = scmp.ne.s32.totalorder %s784_s14, %s780_s13  ;;  %p49_p1 = scmp.eq.s32.totalorder %s804_s19, 0 }
   0xa   : > { %p54_p2 = scmp.ne.s32.totalorder %s780_s13, %s776_s12  ;;  %p875_p3 = scmp.eq.s32.totalorder %s534_s20, 0 }
   0xb   : > { %p538_p4 = scmp.ge.s32.totalorder %s804_s19, 1  ;;  %p50_p5 = por %p49_p1, %p48_p0 }
   0xc   : > { %p138_p6 = scmp.lt.s32.totalorder %s804_s19, 5  ;;  %p883_p7 = por %p875_p3, %p54_p2 }
   0xd   : > { %s806_s24 = smov [#allocation4]   ;;  %p609_p11 = scmp.lt.s32.totalorder %s804_s19, 4 }
   0xe   : > { %s1046_s22 = scalar_select %p883_p7, 1, 0 }
   0xf   : > { %p887_p8 = pnand %p538_p4, %p138_p6  ;;  %s150_s25 = sshll.u32 %s806_s24, 4  ;;  %s151_s25 = int_to_ptr.vmem [resolvable:$true] %s150_s25 }
  0x10   : > { %p900_p12 = pnand %p609_p11, %p50_p5  ;;  %s691_s28 = scalar_lea.vmem %s151_s25, 512 }
  0x11   : > { %s1047_s23 = scalar_select %p887_p8, 1, 0 }
  0x12   : > { %p600_p9 = pneg %p887_p8  ;;  %p692_p0 = scmp.ne.s32.totalorder %s151_s25, %s691_s28 }
  0x13   : > { %p699_p4 = scmp.lt.s32.totalorder %s151_s25, %s151_s25  ;;  %p700_p6 = scmp.lt.s32.totalorder %s691_s28, %s691_s28 }
  0x14   : > { %p895_p10 = pnand %p600_p9, %p875_p3 }
  0x15   : > { %p701_p7 = por %p700_p6, %p699_p4 }
  0x16   : > { %p682_p13 = pneg %p895_p10 }
  0x18   : > { %p694_p1 = pnand %p692_p0, %p682_p13 }
  0x1a   : > { %p695_p2 = pneg %p694_p1 }
  0x1c   : > { %p702_p8 = pnand %p701_p7, %p695_p2 }
  0x1e   : > { %705 = shalt.err (!%p702_p8)
}
  0x1f   : > { %s1040_s29 = smov 128   ;;  %s1041_s30 = smov 8  }
  0x20   : > { %s1050_s1 = sld [smem:[#allocation9_spill]]  ;;  %s27_s6 = sadd.s32 1, %s796_s17 }
  0x21   : > { %s536_s7 = sshll.u32 %s800_s18, 1  ;;  %p28_p5 = scmp.ge.s32.totalorder %s27_s6, 2 }
  0x22   : > { %s30_s8 = sadd.s32 1, %s800_s18  ;;  %s35_s9 = sadd.s32 %s796_s17, %s536_s7 }
  0x23   : > { %s164_s10 = sand.u32 1, %s784_s14   ;;  %s1064_s6 = smov (%p28_p5, %s27_s6), 0 }
  0x24   : > { %s1066_s8 = smov (!%p28_p5, %s30_s8), %s800_s18  ;;  %s592_s11 = smul.u32 40, %s164_s10 }
  0x25   : > { %p32_p7 = scmp.ge.s32.totalorder %s1066_s8, 2  ;;  %s542_s12 = sshll.u32 %s35_s9, 7 }
  0x26   : > { %603 = dma.hbm_to_vmem [thread:$0]  (!%p895_p10), %s1050_s1, 512, %s151_s25, [#allocation5], %s1040_s29, %s1040_s29, %s1041_s30  }
  0x27   : > { %s1068_s8 = smov (%p32_p7, %s1066_s8), 0  ;;  %s927_s25 = scalar_lea.hbm %s1034_s0, %s542_s12 }
  0x28   : > { %s168_s26 = scalar_lea.vmem [#allocation2], %s592_s11  ;;  %s537_s4 = sshll.u32 %s1068_s8, 1 }
  0x29   : > { %s176_s28 = sshll.u32 %s168_s26, 4  ;;  %s37_s5 = sadd.s32 %s537_s4, %s1064_s6  ;;  %s177_s28 = int_to_ptr.vmem [resolvable:$true] %s176_s28 }
  0x2a   : > { %s38_s7 = ssub.s32 %s35_s9, %s37_s5  ;;  %s41_s29 = sadd.s32 1, %s784_s14 }
  0x2b   : > { %p932_p8 = scmp.eq.s32.totalorder %s38_s7, 0  ;;  %s165_s1 = scalar_lea.sflag [#allocation3], %s164_s10 }
  0x2c   : > { %p708_p9 = pneg %p900_p12  ;;  %s719_s18 = scalar_lea.vmem %s177_s28, 640 }
  0x2d   : > { %p720_p10 = scmp.ne.s32.totalorder %s177_s28, %s719_s18  ;;  %s809_s12 = smov [#allocation2]  }
  0x2e   : > { %s724_s20 = sshll.u32 %s809_s12, 4  ;;  %s725_s20 = int_to_ptr.vmem [resolvable:$false] %s724_s20 }
  0x2f   : > { %p722_p11 = pnand %p720_p10, %p708_p9  ;;  %s726_s11 = scalar_lea.vmem %s725_s20, 1280 }
  0x30   : > { %p727_p0 = scmp.lt.s32.totalorder %s177_s28, %s725_s20  ;;  %p728_p1 = scmp.lt.s32.totalorder %s726_s11, %s719_s18 }
  0x31   : > { %p723_p13 = pneg %p722_p11 }
  0x32   : > { %p729_p2 = por %p728_p1, %p727_p0 }
  0x34   : > { %p730_p4 = pnand %p729_p2, %p723_p13 }
  0x36   : > { %733 = shalt.err (!%p730_p4)
}
  0x37   : > { %s810_s9 = smov 512   ;;  %s1052_s24 = smov 8  }
  0x38   : > { %s1053_s10 = smov 128   ;;  %p1054_p6 = scmp.ne.s32.totalorder %s1047_s23, 0 }
  0x39   : > { %607 = dma.hbm_to_vmem [thread:$0]  (!%p900_p12), %s927_s25, 640, %s177_s28, %s165_s1, %s810_s9, %s1053_s10, %s1052_s24  }
  0x3a   : > { %s946_s26 = scalar_select %p932_p8, %s784_s14, %s41_s29  }
  0x3b   : > { %188 = sbr.rel (%p1054_p6) target bundleno = 438 (0x1b6), region = 28  ;;  %s190_s18 = sand.u32 (!%p1054_p6), 1, %s780_s13  }
  0x3c   : > { %s593_s4 = smul.u32 (!%p1054_p6), 40, %s190_s18  ;;  %s191_s5 = scalar_lea.sflag (!%p1054_p6), [#allocation3], %s190_s18 }
  0x3d   : > { %p1055_p5 = scmp.ne.s32.totalorder (!%p1054_p6), %s1046_s22, 0 }
  0x3e   : > { %s951_s7 = scalar_lea.vmem (!%p1054_p6), [#allocation2], %s593_s4 }
  0x40   : > { %767 = dma.done.wait (%p1055_p5), %s191_s5, 640  }
  0x41   : > { %769 = vsyncadd (%p1055_p5), %s191_s5, 4294966656 }
  0x42   : > { %771 = dma.done.wait (%p875_p3), [#allocation5], 512  }
  0x43   : > { %773 = vsyncadd (%p875_p3), [#allocation5], 4294966784  ;;  %s545_s1 = sshll.u32 %s792_s16, 2  ;;  %p549_p7 = scmp.ne.s32.totalorder %s788_s15, 0 }
  0x44   : > { %p229_p12 = scmp.lt.s32.totalorder %s545_s1, 7 }
  0x45   : > { %243 = sbr.rel (%p549_p7) target bundleno = 79 (0x4f), region = 40 }
  0x46   : > { %s1070_s1 = smov (!%p229_p12, %s545_s1), 7 }
  0x47   : > { %s546_s23 = sshll.u32 %s1070_s1, 3 }
  0x48   : > { %s965_s30 = scalar_lea.vmem %s1036_s2, %s546_s23  ;;  %s970_s22 = scalar_lea.vmem %s1037_s3, %s546_s23 }
  0x4a   : > { %vm244_vm0 = vcmask 7168   ;;  %v811_v0 = vmov 0.0  }
  0x4b   : > { %245 = vst.msk [vmem:[%s965_s30] sm:$0xff] %vm244_vm0, %v811_v0  ;;  %249 = vst.msk [vmem:[%s970_s22] sm:$0xff] %vm244_vm0, %v811_v0 }
  0x4c   : > { %246 = vst.msk [vmem:[%s965_s30 + $0x8] sm:$0xff] %vm244_vm0, %v811_v0  ;;  %250 = vst.msk [vmem:[%s970_s22 + $0x8] sm:$0xff] %vm244_vm0, %v811_v0 }
  0x4d   : > { %247 = vst.msk [vmem:[%s965_s30 + $0x10] sm:$0xff] %vm244_vm0, %v811_v0  ;;  %251 = vst.msk [vmem:[%s970_s22 + $0x10] sm:$0xff] %vm244_vm0, %v811_v0 }
  0x4e   : > { %248 = vst.msk [vmem:[%s965_s30 + $0x18] sm:$0xff] %vm244_vm0, %v811_v0  ;;  %252 = vst.msk [vmem:[%s970_s22 + $0x18] sm:$0xff] %vm244_vm0, %v811_v0 }
  0x4f PF: > { %v261_v1 = vld [vmem:[%s951_s7 + $0x20] sm:$0xf]  ;;  %vm275_vm1 = vcmask 1043456   ;;  %v260_v2 = vld [vmem:[%s951_s7 + $0x18] sm:$0xff]  ;;  %v259_v3 = vld [vmem:[%s951_s7 + $0x10] sm:$0xff]  ;;  %vm262_vm2 = vcmask 293888  }
  0x50   : > { %566 = vmatprep.subr.msk.mxu0 %vm275_vm1, %v261_v1  ;;  %582 = vmatprep.subr.msk.mxu1 %vm275_vm1, %v261_v1  ;;  %v258_v4 = vld [vmem:[%s951_s7 + $0x8] sm:$0xff]  ;;  %v257_v5 = vld [vmem:[%s951_s7] sm:$0xff]  ;;  %v254_v7 = vld [vmem:[#allocation4 + $0x8] sm:$0xff]  ;;  %vm380_vm3 = vcmask 7168  }
  0x51   : > { %567 = vmatpush3.msk.msra.mxu0 %vm275_vm1, %v261_v1  ;;  %587 = vmatpush3.msk.msra.mxu1 %vm275_vm1, %v261_v1  ;;  %v253_v6 = vld [vmem:[#allocation4] sm:$0xff]  ;;  %v255_v8 = vld [vmem:[#allocation4 + $0x10] sm:$0xff]  ;;  %v256_v9 = vld [vmem:[#allocation4 + $0x18] sm:$0xff] }
  0x52   : > { %568 = vmatprep.subr.mxu0 %v260_v2  ;;  %583 = vmatprep.subr.mxu1 %v260_v2  ;;  %v364_v19 = vld [vmem:[%s965_s30] sm:$0xff] }
  0x53   : > { %569 = vmatpush3.msra.mxu0 %v260_v2  ;;  %588 = vmatpush3.msra.mxu1 %v260_v2  ;;  %v365_v20 = vld [vmem:[%s965_s30 + $0x8] sm:$0xff]  ;;  %v385_v30 = vld [vmem:[%s970_s22] sm:$0xff] }
  0x54   : > { %570 = vmatprep.subr.mxu0 %v259_v3  ;;  %584 = vmatprep.subr.mxu1 %v259_v3  ;;  %v366_v22 = vld [vmem:[%s965_s30 + $0x10] sm:$0xff]  ;;  %v386_v31 = vld [vmem:[%s970_s22 + $0x8] sm:$0xff] }
  0x55   : > { %571 = vmatpush3.msra.mxu0 %v259_v3  ;;  %589 = vmatpush3.msra.mxu1 %v259_v3  ;;  %v367_v23 = vld [vmem:[%s965_s30 + $0x18] sm:$0xff]  ;;  %v387_v32 = vld [vmem:[%s970_s22 + $0x10] sm:$0xff] }
  0x56   : > { %572 = vmatprep.subr.mxu0 %v258_v4  ;;  %585 = vmatprep.subr.mxu1 %v258_v4  ;;  %v388_v34 = vld [vmem:[%s970_s22 + $0x18] sm:$0xff] }
  0x57   : > { %573 = vmatpush3.msra.mxu0 %v258_v4  ;;  %590 = vmatpush3.msra.mxu1 %v258_v4 }
  0x58   : > { %574 = vmatprep.subr.mxu0 %v257_v5  ;;  %576 = vmatprep.mubr.msk.f32.mxu0 %vm262_vm2, %v253_v6 }
  0x59   : > { %575 = vmatpush3.msra.mxu0 %v257_v5  ;;  %586 = vmatprep.subr.mxu1 %v257_v5 }
  0x5a   : > { %577 = vmatmul.mubr.msk.f32.vlgmr.msra.gmra.mxu0 %vm262_vm2, %v254_v7  ;;  %591 = vmatpush3.msra.mxu1 %v257_v5 }
  0x5b   : > { %579 = vmatprep.mubr.msk.f32.mxu1 %vm262_vm2, %v255_v8 }
  0x5c   : > { %580 = vmatmul.mubr.msk.f32.vlgmr.msra.gmra.mxu1 %vm262_vm2, %v256_v9 }
 0x11a   : > { %v578_v10 = vpop.f32.mrf.mxu0 }
 0x11b   : > { %370 = vadd.xlane.f32.xlu1 %v578_v10  ;;  %v390_v13 = vmul.f32 %v578_v10, %v578_v10 }
 0x11c   : > { %v345_v11 = vpop.f32.mrf.mxu0  ;;  %v581_v12 = vpop.f32.mrf.mxu1 }
 0x11d   : > { %368 = vadd.xlane.f32.xlu0 %v345_v11  ;;  %v389_v16 = vmul.f32 %v345_v11, %v345_v11  ;;  %v392_v17 = vmul.f32 %v581_v12, %v581_v12 }
 0x11e   : > { %v355_v14 = vpop.f32.mrf.mxu1 }
 0x11f   : > { %395 = vadd.xlane.f32.xlu1 %v390_v13  ;;  %v391_v15 = vmul.f32 %v355_v14, %v355_v14 }
 0x121   : > { %372 = vadd.xlane.f32.xlu0 %v355_v14 }
 0x123   : > { %397 = vadd.xlane.f32.xlu1 %v391_v15 }
 0x125   : > { %393 = vadd.xlane.f32.xlu0 %v389_v16 }
 0x127   : > { %399 = vadd.xlane.f32.xlu1 %v392_v17 }
 0x129   : > { %374 = vadd.xlane.f32.xlu0 %v581_v12 }
 0x1a4   : > { %v371_v18 = vpop.xlane.xlu1 %370 }
 0x1a5   : > { %v377_v25 = vadd.f32 %v371_v18, %v365_v20 }
 0x1a6   : > { %v369_v21 = vpop.xlane.xlu0 %368 }
 0x1a7   : > { %v376_v24 = vadd.f32 %v369_v21, %v364_v19  ;;  %382 = vst.msk [vmem:[%s965_s30 + $0x8] sm:$0xff] %vm380_vm3, %v377_v25 }
 0x1a8   : > { %v396_v26 = vpop.xlane.xlu1 %395 }
 0x1a9   : > { %381 = vst.msk [vmem:[%s965_s30] sm:$0xff] %vm380_vm3, %v376_v24  ;;  %v402_v36 = vadd.f32 %v396_v26, %v386_v31 }
 0x1aa   : > { %v373_v27 = vpop.xlane.xlu0 %372 }
 0x1ab   : > { %v378_v28 = vadd.f32 %v373_v27, %v366_v22  ;;  %406 = vst.msk [vmem:[%s970_s22 + $0x8] sm:$0xff] %vm380_vm3, %v402_v36 }
 0x1ac   : > { %v398_v29 = vpop.xlane.xlu1 %397 }
 0x1ad   : > { %383 = vst.msk [vmem:[%s965_s30 + $0x10] sm:$0xff] %vm380_vm3, %v378_v28  ;;  %v403_v38 = vadd.f32 %v398_v29, %v387_v32 }
 0x1ae   : > { %v394_v33 = vpop.xlane.xlu0 %393 }
 0x1af   : > { %v401_v35 = vadd.f32 %v394_v33, %v385_v30  ;;  %407 = vst.msk [vmem:[%s970_s22 + $0x10] sm:$0xff] %vm380_vm3, %v403_v38 }
 0x1b0   : > { %v400_v37 = vpop.xlane.xlu1 %399 }
 0x1b1   : > { %v404_v39 = vadd.f32 %v400_v37, %v388_v34  ;;  %405 = vst.msk [vmem:[%s970_s22] sm:$0xff] %vm380_vm3, %v401_v35 }
 0x1b2   : > { %v375_v40 = vpop.xlane.xlu0 %374 }
 0x1b3   : > { %v379_v41 = vadd.f32 %v375_v40, %v367_v23  ;;  %408 = vst.msk [vmem:[%s970_s22 + $0x18] sm:$0xff] %vm380_vm3, %v404_v39 }
 0x1b5   : > { %384 = vst.msk [vmem:[%s965_s30 + $0x18] sm:$0xff] %vm380_vm3, %v379_v41 }
 0x1b6 PF: > { %s18_s19 = sadd.s32 1, %s804_s19   ;;  %s1056_s16 = sld [smem:[#allocation8_spill]] }
 0x1b7   : > { %p15_p3 = scmp.ge.s32.totalorder %s18_s19, 6   ;;  %s1057_s12 = smov %s780_s13 }
 0x1b8   : > { %s1058_s13 = smov %s784_s14  ;;  %s1059_s14 = smov %s946_s26 }
 0x1b9   : > { %s1060_s15 = smov %s796_s17  ;;  %s1061_s17 = smov %s1064_s6 }
 0x1ba   : > { %s1062_s18 = smov %s1068_s8  ;;  %17 = sbr.rel (!%p15_p3) target bundleno = 8 (0x8), region = 88 }
 0x1bf   :  { %448 = vsyncpa [#allocation3], 1 }
 0x1c0   :  { %450 = vsyncpa [#allocation3 + $0x1], 1 }
 0x1c1   :  { %451 = vsyncpa [#allocation5], 1 }

</bundles_post_ra>
